<compile_context>
chip_gen: v6e
topology: v6e:2x2x1
jax: 0.10.0
libtpu: 0.0.40
codegen_flags: <defaults>
</compile_context>

<pallas_src>
import jax
import jax.numpy as jnp
from jax.experimental import pallas as pl
from jax.experimental.pallas import tpu as pltpu


def _modulate_kernel(scale_ref, shift_ref, x_ref, o_ref):
    # scale_ref, shift_ref : (1, C, 1)      per-batch, per-channel affine
    # x_ref, o_ref         : (1, C, T_hw)   spatial tile (lanes = HW)
    o_ref[...] = (x_ref[...] * scale_ref[...] + shift_ref[...]).astype(o_ref.dtype)


def _pick_hw_tile(hw, c, itemsize, target_bytes=4 << 20):
    """Largest HW tile that is a multiple of 128, divides hw, and keeps one
    (C, T_hw) tile under ~target_bytes.  Falls back to the full extent when
    hw is not lane-aligned (full-extent block dims are always legal)."""
    if hw % 128 != 0:
        return hw
    max_rows = max(128, (target_bytes // max(1, c * itemsize)) // 128 * 128)
    t = min(hw, max_rows)
    while hw % t != 0:
        t -= 128
    return t


def timestep_block(x_nchw, t, weight, bias):
    """x_nchw: (B, C, H, W), t: (B, Ct), weight: (2C, Ct), bias: (2C,)."""
    B, C, H, W = x_nchw.shape
    HW = H * W
    x = x_nchw.reshape(B, C, HW)          # free view, no data movement

    # Hoisted mapper: one tiny XLA matmul instead of a 1-row MXU matmul per
    # grid step; fold the "1 +" into the scale so the kernel is a pure FMA.
    ab = (t.astype(jnp.float32) @ weight.astype(jnp.float32).T
          + bias.astype(jnp.float32))                          # (B, 2C)
    scale = (1.0 + ab[:, :C]).astype(x.dtype).reshape(B, C, 1)
    shift = ab[:, C:].astype(x.dtype).reshape(B, C, 1)

    t_hw = _pick_hw_tile(HW, C, x.dtype.itemsize)
    grid = (B, HW // t_hw)

    out = pl.pallas_call(
        _modulate_kernel,
        out_shape=jax.ShapeDtypeStruct((B, C, HW), x.dtype),
        grid=grid,
        in_specs=[
            pl.BlockSpec((1, C, 1), lambda b, j: (b, 0, 0)),      # scale
            pl.BlockSpec((1, C, 1), lambda b, j: (b, 0, 0)),      # shift
            pl.BlockSpec((1, C, t_hw), lambda b, j: (b, 0, j)),   # x tile
        ],
        out_specs=pl.BlockSpec((1, C, t_hw), lambda b, j: (b, 0, j)),
        compiler_params=pltpu.CompilerParams(
            dimension_semantics=("parallel", "parallel"),
            vmem_limit_bytes=32 * 1024 * 1024,
        ),
    )(scale, shift, x)

    return out.reshape(B, C, H, W)        # free view back to NCHW


def timestep_block_ref(x_nchw, t, weight, bias):
    """Pure-JAX reference matching the PyTorch forward."""
    ab = t @ weight.T + bias                       # (B, 2C)
    C = x_nchw.shape[1]
    a = ab[:, :C][:, :, None, None]
    b = ab[:, C:][:, :, None, None]
    return x_nchw * (1.0 + a) + b


if __name__ == "__main__":
    B, C, H, W = 2, 4, 16, 16
    Ct = 8

    key = jax.random.PRNGKey(0)
    kx, kt, kw, kb = jax.random.split(key, 4)

    x = jax.random.normal(kx, (B, C, H, W), dtype=jnp.float32)
    t = jax.random.normal(kt, (B, Ct), dtype=jnp.float32)
    # Deterministic synthetic parameters for mapper = Linear(Ct, 2*C).
    weight = jax.random.normal(kw, (2 * C, Ct), dtype=jnp.float32) * 0.1
    bias = jax.random.normal(kb, (2 * C,), dtype=jnp.float32) * 0.1

    out = jax.block_until_ready(timestep_block(x, t, weight, bias))
    ref = timestep_block_ref(x, t, weight, bias)

    assert out.shape == (B, C, H, W)
    assert jnp.allclose(out, ref, atol=1e-5, rtol=1e-5), "mismatch vs reference"
    print("KERNEL_OK")
</pallas_src>

<mosaic_0001>
module attributes {stable_mosaic.version = 11 : i64} {
  func.func @_modulate_kernel(%arg0: i32, %arg1: i32, %arg2: memref<1x4x1xf32, #tpu.memory_space<vmem>>, %arg3: memref<1x4x1xf32, #tpu.memory_space<vmem>>, %arg4: memref<1x4x256xf32, #tpu.memory_space<vmem>>, %arg5: memref<1x4x256xf32, #tpu.memory_space<vmem>>) attributes {dimension_semantics = [#tpu.dimension_semantics<parallel>, #tpu.dimension_semantics<parallel>], iteration_bounds = array<i64: 2, 1>, scalar_prefetch = 0 : i64, scratch_operands = 0 : i64, tpu.core_type = #tpu.core_type<tc>, window_params = [{transform_indices = @transform_0, window_bounds = array<i64: 1, 4, 1>}, {transform_indices = @transform_1, window_bounds = array<i64: 1, 4, 1>}, {transform_indices = @transform_2, window_bounds = array<i64: 1, 4, 256>}, {transform_indices = @transform_3, window_bounds = array<i64: 1, 4, 256>}]} {
    %c0 = arith.constant 0 : index
    %c0_0 = arith.constant 0 : index
    %c0_1 = arith.constant 0 : index
    %0 = vector.load %arg4[%c0, %c0_0, %c0_1] : memref<1x4x256xf32, #tpu.memory_space<vmem>>, vector<1x4x256xf32>
    %c0_2 = arith.constant 0 : index
    %c0_3 = arith.constant 0 : index
    %c0_4 = arith.constant 0 : index
    %1 = vector.load %arg2[%c0_2, %c0_3, %c0_4] : memref<1x4x1xf32, #tpu.memory_space<vmem>>, vector<1x4x1xf32>
    %2 = vector.broadcast %1 : vector<1x4x1xf32> to vector<1x4x256xf32>
    %3 = arith.mulf %0, %2 : vector<1x4x256xf32>
    %c0_5 = arith.constant 0 : index
    %c0_6 = arith.constant 0 : index
    %c0_7 = arith.constant 0 : index
    %4 = vector.load %arg3[%c0_5, %c0_6, %c0_7] : memref<1x4x1xf32, #tpu.memory_space<vmem>>, vector<1x4x1xf32>
    %5 = vector.broadcast %4 : vector<1x4x1xf32> to vector<1x4x256xf32>
    %6 = arith.addf %3, %5 : vector<1x4x256xf32>
    %c0_8 = arith.constant 0 : index
    %c0_9 = arith.constant 0 : index
    %c0_10 = arith.constant 0 : index
    %7 = vector.load %arg5[%c0_8, %c0_9, %c0_10] : memref<1x4x256xf32, #tpu.memory_space<vmem>>, vector<1x4x256xf32>
    tpu.vector_store %arg5[%c0_8, %c0_9, %c0_10], %6 {strides = array<i32>} : memref<1x4x256xf32, #tpu.memory_space<vmem>>, vector<1x4x256xf32>,
    return
  }
  func.func @transform_0(%arg0: i32, %arg1: i32) -> (i32, i32, i32) {
    %c0_i32 = arith.constant 0 : i32
    %c0_i32_0 = arith.constant 0 : i32
    %c0_i32_1 = arith.constant 0 : i32
    return %arg0, %c0_i32, %c0_i32_0 : i32, i32, i32
  }
  func.func @transform_1(%arg0: i32, %arg1: i32) -> (i32, i32, i32) {
    %c0_i32 = arith.constant 0 : i32
    %c0_i32_0 = arith.constant 0 : i32
    %c0_i32_1 = arith.constant 0 : i32
    return %arg0, %c0_i32, %c0_i32_0 : i32, i32, i32
  }
  func.func @transform_2(%arg0: i32, %arg1: i32) -> (i32, i32, i32) {
    %c0_i32 = arith.constant 0 : i32
    %c0_i32_0 = arith.constant 0 : i32
    return %arg0, %c0_i32, %arg1 : i32, i32, i32
  }
  func.func @transform_3(%arg0: i32, %arg1: i32) -> (i32, i32, i32) {
    %c0_i32 = arith.constant 0 : i32
    %c0_i32_0 = arith.constant 0 : i32
    return %arg0, %c0_i32, %arg1 : i32, i32, i32
  }
}

</mosaic_0001>

<bundles_post_ra>
// kernel: tpu_custom_call.1
= control target key start
LH: loop header
LB: loop body
LE: loop exit
PB: predicated region body
PF: predicated region fallthrough
CT: control target
= control target key end

     0   :  { %8 = vsyncpa [#allocation3], 0  ;;  %s662_s0 = inlined_call_operand.vmem [shape: f32[2,4,1], index: 0, kind: input, shape index: {}]   ;;  %s663_s1 = inlined_call_operand.vmem [shape: f32[2,4,1], index: 1, kind: input, shape index: {}]   ;;  %s664_s2 = inlined_call_operand.vmem [shape: f32[2,4,256], index: 2, kind: input, shape index: {}]   ;;  %s665_s3 = inlined_call_operand.hbm [shape: f32[2,4,256], index: 3, kind: output, shape index: {}]  }
   0x1   :  { %10 = vsyncpa [#allocation3 + $0x1], 0  ;;  %s557_s12 = smov 0   ;;  %s559_s13 = smov 0  }
   0x2   :  { %s561_s14 = smov 0   ;;  %s563_s15 = smov 0  }
   0x3   :  { %s565_s16 = smov 0   ;;  %s567_s17 = smov 0  }
   0x4 LB: > { %s381_s18 = sadd.s32 4294967295, %s532_s17   ;;  %s382_s19 = sadd.s32 4294967294, %s532_s17   ;;  %s532_s17 = sphi %s567_s17, %s16_s17   ;;  %s528_s16 = sphi %s565_s16, %s672_s16   ;;  %s524_s15 = sphi %s563_s15, %s671_s15   ;;  %s520_s14 = sphi %s561_s14, %s670_s14   ;;  %s516_s13 = sphi %s559_s13, %s669_s13   ;;  %s512_s12 = sphi %s557_s12, %s668_s12  }
   0x5   : > { %s28_s20 = sadd.s32 1, %s528_s16  ;;  %s117_s21 = sadd.s32 1, %s520_s14 }
   0x6   : > { %p30_p0 = scmp.ge.s32.totalorder %s28_s20, 2  ;;  %p127_p1 = scmp.ne.s32.totalorder %s520_s14, %s516_s13 }
   0x7   : > { %p128_p2 = scmp.eq.s32.totalorder %s381_s18, 1  ;;  %p133_p3 = scmp.ne.s32.totalorder %s516_s13, %s512_s12 }
   0x8   : > { %s674_s20 = smov (%p30_p0, %s28_s20), 0  ;;  %p134_p5 = scmp.eq.s32.totalorder %s382_s19, 1 }
   0x9   : > { %p597_p4 = por %p128_p2, %p127_p1  ;;  %s112_s23 = ssub.s32 %s528_s16, %s674_s20 }
   0xa   : > { %p385_p6 = scmp.ge.s32.totalorder %s532_s17, 1  ;;  %p115_p7 = scmp.eq.s32.totalorder %s112_s23, 0 }
   0xb   : > { %p604_p8 = por %p134_p5, %p133_p3  ;;  %p179_p9 = scmp.lt.s32.totalorder %s532_s17, 3 }
   0xc   : > { %s610_s25 = scalar_select %p115_p7, %s520_s14, %s117_s21  }
   0xd   : > { %p180_p10 = pnand %p385_p6, %p179_p9 }
   0xe   : > { %p215_p11 = scmp.lt.s32.totalorder (!%p180_p10), %s524_s15, 1  ;;  %s212_s7 = sand.u32 (!%p180_p10), 1, %s516_s13  }
   0xf   : > { %183 = sbr.rel (%p180_p10) target bundleno = 170 (0xaa), region = 32  ;;  %s386_s9 = sshll.u32 (!%p180_p10), %s212_s7, 3 }
  0x10   : > { %s397_s19 = sshll.u32 (!%p180_p10), %s524_s15, 7  ;;  %s214_s21 = scalar_lea.vmem (!%p180_p10), [#allocation2], %s386_s9 }
  0x11   : > { %s281_s23 = sshll.u32 (!%p180_p10), %s214_s21, 4  ;;  %s265_s29 = scalar_lea.sflag (!%p180_p10), [#allocation3], %s212_s7  ;;  %s282_s23 = int_to_ptr.vmem [resolvable:$true] %s281_s23 }
  0x12   : > { %s536_s4 = smov (!%p180_p10), [#allocation2]  }
  0x13   : > { %s460_s5 = sshll.u32 (!%p180_p10), %s536_s4, 4  ;;  %s461_s5 = int_to_ptr.vmem [resolvable:$false] %s460_s5 }
  0x14   : > { %v534_v0 = vmov 0   ;;  %s216_s26 = scalar_select %p215_p11, %s524_s15, 1  ;;  %v535_v3 = vmov 839922192   ;;  %v243_v5 = vlaneseq }
  0x15   : > { %455 = vset.pattern.permute.xlu0 %v534_v0  ;;  %v241_v4 = vunpack.c.l.s4 %v535_v3  ;;  %s462_s15 = scalar_lea.vmem %s461_s5, 256  ;;  %p463_p1 = scmp.lt.s32.totalorder %s282_s23, %s461_s5 }
  0x16   : > { %s387_s27 = sshll.u32 %s216_s26, 2  ;;  %v244_v7 = vshrl.u32 %v243_v5, 7  ;;  %s396_s8 = sshll.u32 %s216_s26, 3 }
  0x17   : > { %s218_s30 = scalar_lea.vmem %s662_s0, %s387_s27  ;;  %s222_s6 = scalar_lea.vmem %s663_s1, %s387_s27  ;;  %v242_v6 = vunpack.c.0.s8 %v241_v4 }
  0x18   : > { %v235_v1 = vld [vmem:[%s218_s30] sm:$0xf]  ;;  %s231_s18 = scalar_lea.vmem %s664_s2, %s396_s8  ;;  %s279_s26 = scalar_lea.hbm %s665_s3, %s397_s19 }
  0x19   : > { %238 = vperm.xlu0 %455, %v235_v1   ;;  %v249_v2 = vld [vmem:[%s222_s6] sm:$0xf]  ;;  %v245_v8 = vsub.s32 %v242_v6, %v244_v7  ;;  %s456_s30 = scalar_lea.vmem %s282_s23, 128 }
  0x1a   : > { %v234_v11 = vld [vmem:[%s231_s18] sm:$0xff]  ;;  %p457_p12 = scmp.ne.s32.totalorder %s282_s23, %s456_s30  ;;  %p464_p2 = scmp.lt.s32.totalorder %s462_s15, %s456_s30 }
  0x1c   : > { %p458_p13 = pnand %p457_p12, %p597_p4  ;;  %p465_p3 = por %p464_p2, %p463_p1 }
  0x1d   : > { %252 = vperm.xlu0 %455, %v249_v2  }
  0x1e   : > { %p459_p0 = pneg %p458_p13 }
  0x20   : > { %p466_p5 = pnand %p465_p3, %p459_p0 }
  0x94   : > { %v239_v9 = vpop.permute.xlu0 %238 }
  0x95   : > { %v246_v10 = vrot.slane %v239_v9, %v245_v8 }
  0x97   : > { %v248_v13 = vmul.f32 %v246_v10, %v234_v11 }
  0x98   : > { %v253_v12 = vpop.permute.xlu0 %252 }
  0x99   : > { %v260_v14 = vrot.slane %v253_v12, %v245_v8 }
  0x9b   : > { %v262_v15 = vadd.f32 %v260_v14, %v248_v13 }
  0x9d   : > { %263 = vst [vmem:[%s214_s21] sm:$0xff] %v262_v15 }
  0x9e   : > { %469 = shalt.err (!%p466_p5)
}
  0x9f   : > { %s470_s6 = scalar_lea.hbm %s279_s26, 128  ;;  %s474_s9 = scalar_lea.hbm %s665_s3, 256 }
  0xa0   : > { %p471_p6 = scmp.ne.s32.totalorder %s279_s26, %s470_s6  ;;  %p475_p10 = scmp.lt.s32.totalorder %s279_s26, %s665_s3 }
  0xa1   : > { %p476_p11 = scmp.lt.s32.totalorder %s474_s9, %s470_s6 }
  0xa2   : > { %p472_p7 = pnand %p471_p6, %p597_p4 }
  0xa3   : > { %p477_p12 = por %p476_p11, %p475_p10 }
  0xa4   : > { %p473_p9 = pneg %p472_p7 }
  0xa6   : > { %p478_p13 = pnand %p477_p12, %p473_p9 }
  0xa8   : > { %481 = shalt.err (!%p478_p13)
}
  0xa9   : > { %398 = dma.vmem_to_hbm [thread:$0]  (%p597_p4), %s282_s23, 128, %s279_s26, %s265_s29  }
  0xaa PF: > { %p404_p0 = scmp.ge.s32.totalorder %s532_s17, 2  ;;  %s293_s18 = sand.u32 1, %s512_s12  }
  0xab   : > { %s294_s19 = scalar_lea.sflag [#allocation3], %s293_s18 }
  0xac   : > { %p401_p1 = pnand %p404_p0, %p604_p8 }
  0xae   : > { %p402_p2 = pneg %p401_p1 }
  0xb0   : > { %507 = dma.done.wait (%p402_p2), %s294_s19, 128  }
  0xb1   : > { %509 = vsyncadd (%p402_p2), %s294_s19, 4294967168  ;;  %s16_s17 = sadd.s32 1, %s532_s17   ;;  %s668_s12 = smov %s516_s13 }
  0xb2   : > { %p13_p3 = scmp.ge.s32.totalorder %s16_s17, 4   ;;  %s669_s13 = smov %s520_s14 }
  0xb3   : > { %s670_s14 = smov %s610_s25  ;;  %s671_s15 = smov %s528_s16 }
  0xb4   : > { %s672_s16 = smov %s674_s20  ;;  %15 = sbr.rel (!%p13_p3) target bundleno = 4 (0x4), region = 73 }
  0xb9   :  { %299 = vsyncpa [#allocation3], 1 }
  0xba   :  { %301 = vsyncpa [#allocation3 + $0x1], 1 }

</bundles_post_ra>
